<compile_context>
chip_gen: v6e
topology: v6e:2x2x1
jax: 0.10.0
libtpu: 0.0.40
codegen_flags: <defaults>
</compile_context>

<pallas_src>
import jax
import jax.numpy as jnp
from jax.experimental import pallas as pl
from jax.experimental.pallas import tpu as pltpu


def _attention_kernel(x_ref, w_ref, b_ref, attended_ref, weights_ref):
    x = x_ref[...]                                            # (tb, D), native dtype
    # MXU matmul with f32 accumulation; operands may be pre-cast to bf16 by the
    # wrapper (W) / here (x) to stay on the bf16 MXU rate.
    logits = jnp.dot(x.astype(w_ref.dtype), w_ref[...],
                     preferred_element_type=jnp.float32)      # (tb, H) f32
    attn = jax.nn.sigmoid(logits + b_ref[...])                # f32 (exp on EUP)
    weights_ref[...] = attn.astype(weights_ref.dtype)
    if attended_ref.dtype == jnp.bfloat16:
        # bf16 VPU multiply (v6e/v7x native; legalized on v5e).
        attended_ref[...] = attn.astype(jnp.bfloat16) * x.astype(jnp.bfloat16)
    else:
        attended_ref[...] = (attn * x.astype(jnp.float32)).astype(attended_ref.dtype)


def _round_up(x, m):
    return ((x + m - 1) // m) * m


def attention_mechanism(external_input, weight_t, bias, *,
                        tile_b=None, weights_dtype=None, matmul_dtype=None):
    """external_input: (B, D); weight_t: (D, H) (pre-transposed nn.Linear weight);
    bias: (H,).  Requires H == D.  Returns (attended_input, attention_weights).

    weights_dtype: dtype of the attention_weights output (default: input dtype;
                   pass jnp.bfloat16 to cut output HBM traffic ~25%).
    matmul_dtype:  MXU operand dtype (default: bf16 for f32 inputs at D >= 512).
    hidden_state from the PyTorch module is unused by the forward and omitted."""
    B, D = external_input.shape
    H = weight_t.shape[1]
    assert weight_t.shape[0] == D and H == D, "hidden_size must equal input_size"

    out_dtype = external_input.dtype
    w_out_dtype = jnp.dtype(weights_dtype) if weights_dtype is not None else jnp.dtype(out_dtype)
    elt = jnp.dtype(out_dtype).itemsize
    w_out_elt = jnp.dtype(w_out_dtype).itemsize

    # --- MXU operand dtype ----------------------------------------------------
    if matmul_dtype is None:
        matmul_dtype = jnp.bfloat16 if (out_dtype == jnp.float32 and D >= 512) else out_dtype
    w_mxu = weight_t.astype(matmul_dtype)
    w_elt = jnp.dtype(matmul_dtype).itemsize
    bias_row = bias.astype(jnp.float32).reshape(1, H)

    # --- per-chip VMEM budget & tile sizing ------------------------------------
    try:
        vmem_cap = pltpu.get_tpu_info().vmem_capacity_bytes
    except Exception:  # no TPU visible at trace time — assume the smallest (v7x)
        vmem_cap = 64 << 20
    budget = int(0.75 * vmem_cap)

    # Every input is double-buffered by default -> count W and bias twice.
    resident = 2 * (D * H * w_elt) + 2 * (8 * _round_up(H, 128) * 4)
    # Per batch-row bytes, double-buffered: x tile + attended tile + weights tile.
    per_row = 2 * (D * elt + D * elt + H * w_out_elt)

    max_tb = max((budget - resident) // per_row, 8)
    max_tb = (max_tb // 8) * 8

    target = tile_b if tile_b is not None else 1024     # big tiles amortize step cost
    tb = min(_round_up(target, 8), max_tb)
    # Keep >= 4 grid steps when B allows it (megacore sharding + DMA overlap).
    tb = min(tb, _round_up(pl.cdiv(B, 4), 8))
    tb = max(min(tb, _round_up(B, 8)), 8)
    grid = (pl.cdiv(B, tb),)                             # ragged last block is fine

    vmem_limit = int(min(max(resident + per_row * tb + (4 << 20), 16 << 20), budget))

    cost = pl.CostEstimate(
        flops=int(2 * B * D * H + 3 * B * D),
        transcendentals=int(B * H),
        bytes_accessed=int(B * D * elt + D * H * w_elt + H * 4
                           + B * D * elt + B * H * w_out_elt),
    )

    attended, weights = pl.pallas_call(
        _attention_kernel,
        out_shape=(
            jax.ShapeDtypeStruct((B, D), out_dtype),     # attended_input
            jax.ShapeDtypeStruct((B, H), w_out_dtype),   # attention_weights
        ),
        grid=grid,
        in_specs=[
            pl.BlockSpec((tb, D), lambda i: (i, 0)),     # x: tiled along batch
            pl.BlockSpec((D, H), lambda i: (0, 0)),      # W: VMEM-resident
            pl.BlockSpec((1, H), lambda i: (0, 0)),      # bias: VMEM-resident
        ],
        out_specs=(
            pl.BlockSpec((tb, D), lambda i: (i, 0)),
            pl.BlockSpec((tb, H), lambda i: (i, 0)),
        ),
        compiler_params=pltpu.CompilerParams(
            dimension_semantics=("parallel",),           # megacore-shard the batch
            vmem_limit_bytes=vmem_limit,
        ),
        cost_estimate=cost,
    )(external_input, w_mxu, bias_row)

    return attended, weights


def init_params(key, input_size, hidden_size, dtype=jnp.float32):
    """Deterministic init mimicking nn.Linear default (uniform +/- 1/sqrt(in))."""
    k_w, k_b = jax.random.split(key)
    bound = 1.0 / jnp.sqrt(jnp.float32(input_size))
    # PyTorch stores weight as (hidden, input); we keep the transpose (input, hidden).
    weight_t = jax.random.uniform(k_w, (input_size, hidden_size),
                                  minval=-bound, maxval=bound, dtype=dtype)
    bias = jax.random.uniform(k_b, (hidden_size,),
                              minval=-bound, maxval=bound, dtype=dtype)
    return weight_t, bias


def _reference(x, weight_t, bias):
    w = jax.nn.sigmoid(x.astype(jnp.float32) @ weight_t.astype(jnp.float32)
                       + bias.astype(jnp.float32)[None, :])
    return w * x.astype(jnp.float32), w


if __name__ == "__main__":
    key = jax.random.PRNGKey(0)
    k_x, k_p, k_x2 = jax.random.split(key, 3)

    batch = 8
    input_size = 32
    hidden_size = 32   # must equal input_size for the elementwise product

    x = jax.random.normal(k_x, (batch, input_size), dtype=jnp.float32)
    weight_t, bias = init_params(k_p, input_size, hidden_size)

    # --- small-shape correctness check (f32) ---------------------------------
    attended, attn_weights = attention_mechanism(x, weight_t, bias)
    jax.block_until_ready((attended, attn_weights))
    ref_attended, ref_w = _reference(x, weight_t, bias)
    assert jnp.allclose(attn_weights, ref_w, atol=1e-5), "attention weights mismatch"
    assert jnp.allclose(attended, ref_attended, atol=1e-5), "attended input mismatch"

    # --- ragged batch grid (B % tb != 0) exercises Pallas partial last block --
    x_big = jax.random.normal(k_x2, (300, input_size), dtype=jnp.float32)
    att_b, w_b = attention_mechanism(x_big, weight_t, bias, tile_b=64)
    jax.block_until_ready((att_b, w_b))
    ref_att_b, ref_w_b = _reference(x_big, weight_t, bias)
    assert jnp.allclose(w_b, ref_w_b, atol=1e-5), "gridded weights mismatch"
    assert jnp.allclose(att_b, ref_att_b, atol=1e-5), "gridded attended mismatch"

    # --- bf16 smoke test (bf16 operands, f32 accumulation inside) ------------
    att16, w16 = attention_mechanism(x.astype(jnp.bfloat16),
                                     weight_t.astype(jnp.bfloat16),
                                     bias.astype(jnp.bfloat16))
    jax.block_until_ready((att16, w16))
    assert jnp.allclose(w16.astype(jnp.float32), ref_w, atol=5e-2), "bf16 weights off"

    # --- reduced-precision weights output path (bandwidth saver) -------------
    att_wd, w_wd = attention_mechanism(x, weight_t, bias, weights_dtype=jnp.bfloat16)
    jax.block_until_ready((att_wd, w_wd))
    assert jnp.allclose(w_wd.astype(jnp.float32), ref_w, atol=5e-2), "bf16-out weights off"

    print("KERNEL_OK")
</pallas_src>

<mosaic_0001>
module attributes {stable_mosaic.version = 11 : i64} {
  func.func @_attention_kernel(%arg0: i32, %arg1: memref<8x32xf32, #tpu.memory_space<vmem>>, %arg2: memref<32x32xf32, #tpu.memory_space<vmem>>, %arg3: memref<1x32xf32, #tpu.memory_space<vmem>>, %arg4: memref<8x32xf32, #tpu.memory_space<vmem>>, %arg5: memref<8x32xf32, #tpu.memory_space<vmem>>) attributes {dimension_semantics = [#tpu.dimension_semantics<parallel>], iteration_bounds = array<i64: 1>, scalar_prefetch = 0 : i64, scratch_operands = 0 : i64, tpu.core_type = #tpu.core_type<tc>, window_params = [{transform_indices = @transform_0, window_bounds = array<i64: 8, 32>}, {pipeline_mode = #tpu.pipeline_mode<synchronous>, transform_indices = @transform_1, window_bounds = array<i64: 32, 32>}, {pipeline_mode = #tpu.pipeline_mode<synchronous>, transform_indices = @transform_2, window_bounds = array<i64: 1, 32>}, {transform_indices = @transform_3, window_bounds = array<i64: 8, 32>}, {transform_indices = @transform_4, window_bounds = array<i64: 8, 32>}]} {
    %c0 = arith.constant 0 : index
    %c0_0 = arith.constant 0 : index
    %0 = vector.load %arg1[%c0, %c0_0] : memref<8x32xf32, #tpu.memory_space<vmem>>, vector<8x32xf32>
    %c0_1 = arith.constant 0 : index
    %c0_2 = arith.constant 0 : index
    %1 = vector.load %arg2[%c0_1, %c0_2] : memref<32x32xf32, #tpu.memory_space<vmem>>, vector<32x32xf32>
    %cst = arith.constant dense<0.000000e+00> : vector<8x32xf32>
    %2 = tpu.matmul %0, %1, %cst {dimension_numbers = #tpu.dot_dimension_numbers<[1], [0], [0], [1], [0, 0, 1, 1], [], []>} : vector<8x32xf32>, vector<32x32xf32>, vector<8x32xf32> -> vector<8x32xf32>
    %c0_3 = arith.constant 0 : index
    %c0_4 = arith.constant 0 : index
    %3 = vector.load %arg3[%c0_3, %c0_4] : memref<1x32xf32, #tpu.memory_space<vmem>>, vector<1x32xf32>
    %4 = vector.broadcast %3 : vector<1x32xf32> to vector<8x32xf32>
    %5 = arith.addf %2, %4 : vector<8x32xf32>
    %6 = arith.negf %5 : vector<8x32xf32>
    %7 = math.exp %6 : vector<8x32xf32>
    %cst_5 = arith.constant 1.000000e+00 : f32
    %8 = vector.broadcast %cst_5 : f32 to vector<8x32xf32>
    %9 = arith.addf %8, %7 : vector<8x32xf32>
    %10 = arith.divf %8, %9 : vector<8x32xf32>
    %c0_6 = arith.constant 0 : index
    %c0_7 = arith.constant 0 : index
    %11 = vector.load %arg5[%c0_6, %c0_7] : memref<8x32xf32, #tpu.memory_space<vmem>>, vector<8x32xf32>
    tpu.vector_store %arg5[%c0_6, %c0_7], %10 {strides = array<i32>} : memref<8x32xf32, #tpu.memory_space<vmem>>, vector<8x32xf32>,
    %12 = arith.mulf %10, %0 : vector<8x32xf32>
    %c0_8 = arith.constant 0 : index
    %c0_9 = arith.constant 0 : index
    %13 = vector.load %arg4[%c0_8, %c0_9] : memref<8x32xf32, #tpu.memory_space<vmem>>, vector<8x32xf32>
    tpu.vector_store %arg4[%c0_8, %c0_9], %12 {strides = array<i32>} : memref<8x32xf32, #tpu.memory_space<vmem>>, vector<8x32xf32>,
    return
  }
  func.func @transform_0(%arg0: i32) -> (i32, i32) {
    %c0_i32 = arith.constant 0 : i32
    %c0_i32_0 = arith.constant 0 : i32
    return %arg0, %c0_i32 : i32, i32
  }
  func.func @transform_1(%arg0: i32) -> (i32, i32) {
    %c0_i32 = arith.constant 0 : i32
    %c0_i32_0 = arith.constant 0 : i32
    %c0_i32_1 = arith.constant 0 : i32
    return %c0_i32, %c0_i32_0 : i32, i32
  }
  func.func @transform_2(%arg0: i32) -> (i32, i32) {
    %c0_i32 = arith.constant 0 : i32
    %c0_i32_0 = arith.constant 0 : i32
    %c0_i32_1 = arith.constant 0 : i32
    return %c0_i32, %c0_i32_0 : i32, i32
  }
  func.func @transform_3(%arg0: i32) -> (i32, i32) {
    %c0_i32 = arith.constant 0 : i32
    %c0_i32_0 = arith.constant 0 : i32
    return %arg0, %c0_i32 : i32, i32
  }
  func.func @transform_4(%arg0: i32) -> (i32, i32) {
    %c0_i32 = arith.constant 0 : i32
    %c0_i32_0 = arith.constant 0 : i32
    return %arg0, %c0_i32 : i32, i32
  }
}

</mosaic_0001>

<bundles_post_ra>
// kernel: tpu_custom_call.1
= control target key start
LH: loop header
LB: loop body
LE: loop exit
PB: predicated region body
PF: predicated region fallthrough
CT: control target
= control target key end

     0   :  { %10 = vsyncpa [#allocation3], 0  ;;  %s339_s0 = inlined_call_operand.hbm [shape: f32[8,32], index: 0, kind: input, shape index: {}]   ;;  %s340_s1 = inlined_call_operand.hbm [shape: f32[32,32], index: 1, kind: input, shape index: {}]   ;;  %s341_s2 = inlined_call_operand.vmem [shape: f32[1,32], index: 2, kind: input, shape index: {}]   ;;  %s342_s3 = inlined_call_operand.hbm [shape: f32[8,32], index: 3, kind: output, shape index: {0}]   ;;  %s343_s4 = inlined_call_operand.hbm [shape: f32[8,32], index: 4, kind: output, shape index: {1}]  }
   0x1   :  { %11 = vsyncpa [#allocation6], 0 }
   0x2   :  { %12 = vsyncpa [#allocation4], 0 }
   0x3   :  { %13 = vsyncpa [#allocation9], 0  ;;  %s288_s15 = smov [#allocation2]   ;;  %s289_s17 = smov [#allocation5]  }
   0x4   :  { %s20_s16 = sshll.u32 %s288_s15, 4  ;;  %s29_s18 = sshll.u32 %s289_s17, 4  ;;  %s21_s16 = int_to_ptr.vmem [resolvable:$true] %s20_s16  ;;  %s30_s18 = int_to_ptr.vmem [resolvable:$true] %s29_s18 }
   0x5   :  { %s208_s19 = scalar_lea.vmem %s21_s16, 128  ;;  %p213_p1 = scmp.lt.s32.totalorder %s21_s16, %s21_s16 }
   0x6   :  { %p209_p0 = scmp.ne.s32.totalorder %s21_s16, %s208_s19  ;;  %p214_p2 = scmp.lt.s32.totalorder %s208_s19, %s208_s19 }
   0x8   :  { %p215_p3 = por %p214_p2, %p213_p1 }
   0xa   :  { %p216_p4 = pnand %p215_p3, %p209_p0 }
   0xc   :  { %219 = shalt.err (!%p216_p4)
}
   0xd   :  { %23 = dma.hbm_to_vmem [thread:$0]  %s339_s0, 128, %s21_s16, [#allocation3]  }
   0xe   :  { %s228_s22 = scalar_lea.vmem %s30_s18, 512  ;;  %p233_p6 = scmp.lt.s32.totalorder %s30_s18, %s30_s18 }
   0xf   :  { %p229_p5 = scmp.ne.s32.totalorder %s30_s18, %s228_s22  ;;  %p234_p7 = scmp.lt.s32.totalorder %s228_s22, %s228_s22 }
  0x11   :  { %p235_p8 = por %p234_p7, %p233_p6 }
  0x13   :  { %p236_p9 = pnand %p235_p8, %p229_p5 }
  0x15   :  { %239 = shalt.err (!%p236_p9)
}
  0x16   :  { %s290_s23 = smov 128   ;;  %s291_s24 = smov 8  }
  0x17   :  { %35 = dma.hbm_to_vmem [thread:$0]  %s340_s1, 512, %s30_s18, [#allocation6], %s290_s23, %s290_s23, %s291_s24  }
  0x18   :  { %280 = dma.done.wait [#allocation3], 128  }
  0x19   :  { %281 = vsyncadd [#allocation3], 4294967168 }
  0x1a   :  { %282 = dma.done.wait [#allocation6], 512  }
  0x1b   :  { %283 = vsyncadd [#allocation6], 4294966784  ;;  %v292_v0 = vmov 0.0   ;;  %vm293_vm0 = vmmov 0   ;;  %v48_v1 = vld [vmem:[#allocation5 + $0x18] sm:$0xff]  ;;  %v47_v2 = vld [vmem:[#allocation5 + $0x10] sm:$0xff] }
  0x1c   :  { %177 = vmatprep.subr.mxu0 %v292_v0  ;;  %185 = vmatprep.mubr.msk.f32.mxu0 %vm293_vm0, %v292_v0  ;;  %v46_v3 = vld [vmem:[#allocation5 + $0x8] sm:$0xff]  ;;  %v45_v4 = vld [vmem:[#allocation5] sm:$0xff]  ;;  %v44_v5 = vld [vmem:[#allocation2] sm:$0xff]  ;;  %vm56_vm1 = vcmask 261120   ;;  %s294_s27 = smov [#allocation8]   ;;  %s295_s29 = smov [#allocation7]  }
  0x1d   :  { %178 = vmatpush3.msra.mxu0 %v48_v1  ;;  %v169_v6 = vld [vmem:[%s341_s2] ss:$0 sm:$0xff]  ;;  %s155_s28 = sshll.u32 %s294_s27, 4  ;;  %s145_s30 = sshll.u32 %s295_s29, 4  ;;  %s156_s28 = int_to_ptr.vmem [resolvable:$true] %s155_s28  ;;  %s146_s30 = int_to_ptr.vmem [resolvable:$true] %s145_s30 }
  0x1e   :  { %179 = vmatprep.subr.mxu0 %v292_v0  ;;  %s240_s5 = scalar_lea.vmem %s156_s28, 128  ;;  %p245_p11 = scmp.lt.s32.totalorder %s156_s28, %s156_s28 }
  0x1f   :  { %180 = vmatpush3.msra.mxu0 %v47_v2  ;;  %p241_p10 = scmp.ne.s32.totalorder %s156_s28, %s240_s5  ;;  %p246_p12 = scmp.lt.s32.totalorder %s240_s5, %s240_s5 }
  0x20   :  { %181 = vmatprep.subr.mxu0 %v292_v0 }
  0x21   :  { %182 = vmatpush3.msra.mxu0 %v46_v3  ;;  %p247_p13 = por %p246_p12, %p245_p11 }
  0x22   :  { %183 = vmatprep.subr.mxu0 %v292_v0 }
  0x23   :  { %184 = vmatpush3.msra.mxu0 %v45_v4  ;;  %p248_p0 = pnand %p247_p13, %p241_p10 }
  0x24   :  { %186 = vmatmul.mubr.msk.f32.vlgmr.msra.gmra.mxu0 %vm56_vm1, %v44_v5 }
  0xe4   :  { %v126_v7 = vpop.f32.mrf.mxu0 }
  0xe5   :  { %v127_v8 = vadd.f32 %v169_v6, %v126_v7 }
  0xe6   :  { %v187_v9 = vpop.f32.mrf.mxu0 }
  0xe7   :  { %v171_v10 = vmul.f32 -1.442695, %v127_v8 }
  0xe9   :  { %196 = vpow2.f32 %v171_v10 }
  0xf6   :  { %v197_v11 = vpop.eup %196 }
  0xf7   :  { %v133_v12 = vadd.f32 1.0, %v197_v11 }
  0xf9   :  { %198 = vrcp.f32 %v133_v12 }
 0x106   :  { %v199_v13 = vpop.eup %198 }
 0x107   :  { %136 = vst.msk [vmem:[#allocation8] sm:$0xff] %vm56_vm1, %v199_v13  ;;  %v137_v14 = vmul.f32 %v199_v13, %v44_v5 }
 0x108   :  { %251 = shalt.err (!%p248_p0)
}
 0x109   :  { %158 = dma.vmem_to_hbm [thread:$0]  %s156_s28, 128, %s343_s4, [#allocation9]   ;;  %138 = vst.msk [vmem:[#allocation7] sm:$0xff] %vm56_vm1, %v137_v14 }
 0x10a   :  { %s260_s7 = scalar_lea.vmem %s146_s30, 128  ;;  %p265_p2 = scmp.lt.s32.totalorder %s146_s30, %s146_s30 }
 0x10b   :  { %p261_p1 = scmp.ne.s32.totalorder %s146_s30, %s260_s7  ;;  %p266_p3 = scmp.lt.s32.totalorder %s260_s7, %s260_s7 }
 0x10d   :  { %p267_p4 = por %p266_p3, %p265_p2 }
 0x10f   :  { %p268_p5 = pnand %p267_p4, %p261_p1 }
 0x111   :  { %271 = shalt.err (!%p268_p5)
}
 0x112   :  { %148 = dma.vmem_to_hbm [thread:$0]  %s146_s30, 128, %s342_s3, [#allocation4]  }
 0x113   :  { %284 = dma.done.wait [#allocation4], 128  }
 0x114   :  { %285 = vsyncadd [#allocation4], 4294967168 }
 0x115   :  { %286 = dma.done.wait [#allocation9], 128  }
 0x116   :  { %287 = vsyncadd [#allocation9], 4294967168 }
 0x117   :  { %165 = vsyncpa [#allocation3], 1 }
 0x118   :  { %166 = vsyncpa [#allocation6], 1 }
 0x119   :  { %167 = vsyncpa [#allocation4], 1 }
 0x11a   :  { %168 = vsyncpa [#allocation9], 1 }

</bundles_post_ra>
